<compile_context>
chip_gen: v7x
topology: tpu7x:2x2x1
jax: 0.10.0
libtpu: 0.0.40
codegen_flags: <defaults>
</compile_context>

<pallas_src>
import jax
import jax.numpy as jnp
from jax.experimental import pallas as pl
from jax.experimental.pallas import tpu as pltpu


def resblock_kernel(x_ref, s_ref, w1_ref, b1_ref, w2_ref, b2_ref, o_ref):
    # x_ref : (1, H, W*C)      lane-dense input rows for one batch element
    # s_ref : (2, H, H)        row-shift matrices: s[0]@x -> row i-1, s[1]@x -> row i+1
    # w1_ref: (3*W*C, W*F)     banded conv1 weight (vertical tap, w_in, c) x (w_out, f)
    # b1_ref: (1, W*F)         bias tiled across W
    # w2_ref: (3*W*F, W*F)     banded conv2 weight
    # b2_ref: (1, W*F)
    # o_ref : (1, H, W*F)
    x = x_ref[0]                       # (H, W*C)
    s_up = s_ref[0]                    # reads row i-1 (zero at i=0)
    s_dn = s_ref[1]                    # reads row i+1 (zero at i=H-1)

    def conv3x3(inp, w_ref, b_ref):
        # Vertical taps via exact shift matmuls (MXU; boundaries are zeros).
        up = jnp.dot(s_up, inp, preferred_element_type=jnp.float32).astype(inp.dtype)
        dn = jnp.dot(s_dn, inp, preferred_element_type=jnp.float32).astype(inp.dtype)
        im = jnp.concatenate([up, inp, dn], axis=-1)          # (H, 3*W*Cin)
        # Single fused matmul: K = 3*W*Cin, N = W*Cout.
        return jnp.dot(im, w_ref[...],
                       preferred_element_type=jnp.float32) + b_ref[...]

    h = jnp.maximum(conv3x3(x, w1_ref, b1_ref), 0.0)          # (H, W*F), ReLU
    y = conv3x3(h, w2_ref, b2_ref)                            # (H, W*F)
    o_ref[0] = (y + x).astype(o_ref.dtype)                    # identity skip (C == F)


def _band_weight(w_hwio, W):
    """Fold the 3 horizontal taps of a 3x3 HWIO conv weight into a block-banded
    matrix of shape (3*W*Cin, W*Cout):
       BW[t*W*Cin + w_in*Cin + c, w_out*Cout + f] = w[t, w_in-w_out+1, c, f]
    (zero outside the band).  Built once, wrapper-side, in plain JAX."""
    kh, kw, cin, cout = w_hwio.shape
    win = jnp.arange(W)[:, None]          # (W, 1)  input column
    wout = jnp.arange(W)[None, :]         # (1, W)  output column
    dx = win - wout + 1                   # horizontal tap index
    valid = (dx >= 0) & (dx < kw)
    g = w_hwio[:, jnp.clip(dx, 0, kw - 1), :, :]           # (kh, W_in, W_out, Cin, Cout)
    g = g * valid[None, :, :, None, None].astype(w_hwio.dtype)
    g = jnp.transpose(g, (0, 1, 3, 2, 4))                  # (kh, W_in, Cin, W_out, Cout)
    return g.reshape(kh * W * cin, W * cout)


def resblock_pallas(x, w1, b1, w2, b2):
    """x: (B, H, W, C) NHWC; w*: (3,3,Cin,Cout) HWIO; b*: (Cout,). -> (B,H,W,F)."""
    B, H, W, C = x.shape
    F = w1.shape[-1]
    assert C == F, "stride=1 resblock requires input_channel == filter_num"

    # Lane-dense views / preprocessed constants (all free or one-time).
    x2d = x.reshape(B, H, W * C)
    shift = jnp.stack([jnp.eye(H, k=-1, dtype=x.dtype),
                       jnp.eye(H, k=1, dtype=x.dtype)])     # (2, H, H)
    bw1 = _band_weight(w1, W)                               # (3*W*C, W*F)
    bw2 = _band_weight(w2, W)                               # (3*W*F, W*F)
    b1r = jnp.tile(b1, W).reshape(1, W * F)
    b2r = jnp.tile(b2, W).reshape(1, W * F)

    grid_spec = pltpu.PrefetchScalarGridSpec(
        num_scalar_prefetch=0,
        grid=(B,),
        in_specs=[
            pl.BlockSpec((1, H, W * C), lambda b: (b, 0, 0)),
            pl.BlockSpec((2, H, H), lambda b: (0, 0, 0)),
            pl.BlockSpec((3 * W * C, W * F), lambda b: (0, 0)),
            pl.BlockSpec((1, W * F), lambda b: (0, 0)),
            pl.BlockSpec((3 * W * F, W * F), lambda b: (0, 0)),
            pl.BlockSpec((1, W * F), lambda b: (0, 0)),
        ],
        out_specs=pl.BlockSpec((1, H, W * F), lambda b: (b, 0, 0)),
    )

    out2d = pl.pallas_call(
        resblock_kernel,
        out_shape=jax.ShapeDtypeStruct((B, H, W * F), x.dtype),
        grid_spec=grid_spec,
        compiler_params=pltpu.CompilerParams(
            dimension_semantics=("parallel",),      # shards batch across v7x TCs
            vmem_limit_bytes=32 * 1024 * 1024),     # explicit budget (fits v7x 64 MiB)
    )(x2d, shift, bw1, b1r, bw2, b2r)
    return out2d.reshape(B, H, W, F)


def resblock_ref(x, w1, b1, w2, b2):
    """Plain-JAX reference (matches PyTorch forward with stride=1)."""
    dn = ("NHWC", "HWIO", "NHWC")
    h = jax.lax.conv_general_dilated(x, w1, (1, 1), "SAME",
                                     dimension_numbers=dn) + b1
    h = jax.nn.relu(h)
    h = jax.lax.conv_general_dilated(h, w2, (1, 1), "SAME",
                                     dimension_numbers=dn) + b2
    return h + x


if __name__ == "__main__":
    B, H, W = 2, 16, 16
    C = F = 8  # input_channel == filter_num (stride=1 identity skip); W*C = 128 lanes

    key = jax.random.PRNGKey(0)
    kx, k1, k2, k3, k4 = jax.random.split(key, 5)
    x = jax.random.normal(kx, (B, H, W, C), dtype=jnp.float32)
    w1 = jax.random.normal(k1, (3, 3, C, F), dtype=jnp.float32) * 0.1
    b1 = jax.random.normal(k2, (F,), dtype=jnp.float32) * 0.1
    w2 = jax.random.normal(k3, (3, 3, F, F), dtype=jnp.float32) * 0.1
    b2 = jax.random.normal(k4, (F,), dtype=jnp.float32) * 0.1

    out = resblock_pallas(x, w1, b1, w2, b2)
    jax.block_until_ready(out)

    ref = resblock_ref(x, w1, b1, w2, b2)
    assert out.shape == (B, H, W, F)
    err = jnp.max(jnp.abs(out - ref))
    assert jnp.allclose(out, ref, atol=1e-3, rtol=1e-3), f"max err {err}"
    print("KERNEL_OK")
</pallas_src>

<mosaic_0001>
module attributes {stable_mosaic.version = 11 : i64} {
  func.func @resblock_kernel(%arg0: i32, %arg1: memref<1x16x128xf32, #tpu.memory_space<vmem>>, %arg2: memref<2x16x16xf32, #tpu.memory_space<vmem>>, %arg3: memref<384x128xf32, #tpu.memory_space<vmem>>, %arg4: memref<1x128xf32, #tpu.memory_space<vmem>>, %arg5: memref<384x128xf32, #tpu.memory_space<vmem>>, %arg6: memref<1x128xf32, #tpu.memory_space<vmem>>, %arg7: memref<1x16x128xf32, #tpu.memory_space<vmem>>) attributes {dimension_semantics = [#tpu.dimension_semantics<parallel>], iteration_bounds = array<i64: 2>, scalar_prefetch = 0 : i64, scratch_operands = 0 : i64, tpu.core_type = #tpu.core_type<tc>, window_params = [{transform_indices = @transform_0, window_bounds = array<i64: 1, 16, 128>}, {pipeline_mode = #tpu.pipeline_mode<synchronous>, transform_indices = @transform_1, window_bounds = array<i64: 2, 16, 16>}, {pipeline_mode = #tpu.pipeline_mode<synchronous>, transform_indices = @transform_2, window_bounds = array<i64: 384, 128>}, {pipeline_mode = #tpu.pipeline_mode<synchronous>, transform_indices = @transform_3, window_bounds = array<i64: 1, 128>}, {pipeline_mode = #tpu.pipeline_mode<synchronous>, transform_indices = @transform_4, window_bounds = array<i64: 384, 128>}, {pipeline_mode = #tpu.pipeline_mode<synchronous>, transform_indices = @transform_5, window_bounds = array<i64: 1, 128>}, {transform_indices = @transform_6, window_bounds = array<i64: 1, 16, 128>}]} {
    %c0 = arith.constant 0 : index
    %c0_0 = arith.constant 0 : index
    %c0_1 = arith.constant 0 : index
    %0 = vector.load %arg1[%c0, %c0_0, %c0_1] : memref<1x16x128xf32, #tpu.memory_space<vmem>>, vector<1x16x128xf32>
    %1 = vector.shape_cast %0 : vector<1x16x128xf32> to vector<16x128xf32>
    %c0_2 = arith.constant 0 : index
    %c0_3 = arith.constant 0 : index
    %c0_4 = arith.constant 0 : index
    %2 = vector.load %arg2[%c0_2, %c0_3, %c0_4] : memref<2x16x16xf32, #tpu.memory_space<vmem>>, vector<1x16x16xf32>
    %3 = vector.shape_cast %2 : vector<1x16x16xf32> to vector<16x16xf32>
    %c1 = arith.constant 1 : index
    %c0_5 = arith.constant 0 : index
    %c0_6 = arith.constant 0 : index
    %4 = vector.load %arg2[%c1, %c0_5, %c0_6] : memref<2x16x16xf32, #tpu.memory_space<vmem>>, vector<1x16x16xf32>
    %5 = vector.shape_cast %4 : vector<1x16x16xf32> to vector<16x16xf32>
    %cst = arith.constant dense<0.000000e+00> : vector<16x128xf32>
    %6 = tpu.matmul %3, %1, %cst {dimension_numbers = #tpu.dot_dimension_numbers<[1], [0], [0], [1], [0, 0, 1, 1], [], []>} : vector<16x16xf32>, vector<16x128xf32>, vector<16x128xf32> -> vector<16x128xf32>
    %cst_7 = arith.constant dense<0.000000e+00> : vector<16x128xf32>
    %7 = tpu.matmul %5, %1, %cst_7 {dimension_numbers = #tpu.dot_dimension_numbers<[1], [0], [0], [1], [0, 0, 1, 1], [], []>} : vector<16x16xf32>, vector<16x128xf32>, vector<16x128xf32> -> vector<16x128xf32>
    %8 = tpu.concatenate %6, %1, %7 in 1 : vector<16x128xf32>, vector<16x128xf32>, vector<16x128xf32> -> vector<16x384xf32>
    %c0_8 = arith.constant 0 : index
    %c0_9 = arith.constant 0 : index
    %9 = vector.load %arg3[%c0_8, %c0_9] : memref<384x128xf32, #tpu.memory_space<vmem>>, vector<384x128xf32>
    %cst_10 = arith.constant dense<0.000000e+00> : vector<16x128xf32>
    %10 = tpu.matmul %8, %9, %cst_10 {dimension_numbers = #tpu.dot_dimension_numbers<[1], [0], [0], [1], [0, 0, 1, 1], [], []>} : vector<16x384xf32>, vector<384x128xf32>, vector<16x128xf32> -> vector<16x128xf32>
    %c0_11 = arith.constant 0 : index
    %c0_12 = arith.constant 0 : index
    %11 = vector.load %arg4[%c0_11, %c0_12] : memref<1x128xf32, #tpu.memory_space<vmem>>, vector<1x128xf32>
    %12 = vector.broadcast %11 : vector<1x128xf32> to vector<16x128xf32>
    %13 = arith.addf %10, %12 : vector<16x128xf32>
    %cst_13 = arith.constant 0.000000e+00 : f32
    %14 = vector.broadcast %cst_13 : f32 to vector<16x128xf32>
    %15 = arith.maximumf %13, %14 : vector<16x128xf32>
    %cst_14 = arith.constant dense<0.000000e+00> : vector<16x128xf32>
    %16 = tpu.matmul %3, %15, %cst_14 {dimension_numbers = #tpu.dot_dimension_numbers<[1], [0], [0], [1], [0, 0, 1, 1], [], []>} : vector<16x16xf32>, vector<16x128xf32>, vector<16x128xf32> -> vector<16x128xf32>
    %cst_15 = arith.constant dense<0.000000e+00> : vector<16x128xf32>
    %17 = tpu.matmul %5, %15, %cst_15 {dimension_numbers = #tpu.dot_dimension_numbers<[1], [0], [0], [1], [0, 0, 1, 1], [], []>} : vector<16x16xf32>, vector<16x128xf32>, vector<16x128xf32> -> vector<16x128xf32>
    %18 = tpu.concatenate %16, %15, %17 in 1 : vector<16x128xf32>, vector<16x128xf32>, vector<16x128xf32> -> vector<16x384xf32>
    %c0_16 = arith.constant 0 : index
    %c0_17 = arith.constant 0 : index
    %19 = vector.load %arg5[%c0_16, %c0_17] : memref<384x128xf32, #tpu.memory_space<vmem>>, vector<384x128xf32>
    %cst_18 = arith.constant dense<0.000000e+00> : vector<16x128xf32>
    %20 = tpu.matmul %18, %19, %cst_18 {dimension_numbers = #tpu.dot_dimension_numbers<[1], [0], [0], [1], [0, 0, 1, 1], [], []>} : vector<16x384xf32>, vector<384x128xf32>, vector<16x128xf32> -> vector<16x128xf32>
    %c0_19 = arith.constant 0 : index
    %c0_20 = arith.constant 0 : index
    %21 = vector.load %arg6[%c0_19, %c0_20] : memref<1x128xf32, #tpu.memory_space<vmem>>, vector<1x128xf32>
    %22 = vector.broadcast %21 : vector<1x128xf32> to vector<16x128xf32>
    %23 = arith.addf %20, %22 : vector<16x128xf32>
    %24 = arith.addf %23, %1 : vector<16x128xf32>
    %c0_21 = arith.constant 0 : index
    %c0_22 = arith.constant 0 : index
    %c0_23 = arith.constant 0 : index
    %25 = vector.load %arg7[%c0_21, %c0_22, %c0_23] : memref<1x16x128xf32, #tpu.memory_space<vmem>>, vector<1x16x128xf32>
    %26 = vector.shape_cast %25 : vector<1x16x128xf32> to vector<16x128xf32>
    %27 = vector.shape_cast %24 : vector<16x128xf32> to vector<1x16x128xf32>
    tpu.vector_store %arg7[%c0_21, %c0_22, %c0_23], %27 {strides = array<i32>} : memref<1x16x128xf32, #tpu.memory_space<vmem>>, vector<1x16x128xf32>,
    return
  }
  func.func @transform_0(%arg0: i32) -> (i32, i32, i32) {
    %c0_i32 = arith.constant 0 : i32
    %c0_i32_0 = arith.constant 0 : i32
    %c0_i32_1 = arith.constant 0 : i32
    return %arg0, %c0_i32, %c0_i32_0 : i32, i32, i32
  }
  func.func @transform_1(%arg0: i32) -> (i32, i32, i32) {
    %c0_i32 = arith.constant 0 : i32
    %c0_i32_0 = arith.constant 0 : i32
    %c0_i32_1 = arith.constant 0 : i32
    %c0_i32_2 = arith.constant 0 : i32
    return %c0_i32, %c0_i32_0, %c0_i32_1 : i32, i32, i32
  }
  func.func @transform_2(%arg0: i32) -> (i32, i32) {
    %c0_i32 = arith.constant 0 : i32
    %c0_i32_0 = arith.constant 0 : i32
    %c0_i32_1 = arith.constant 0 : i32
    return %c0_i32, %c0_i32_0 : i32, i32
  }
  func.func @transform_3(%arg0: i32) -> (i32, i32) {
    %c0_i32 = arith.constant 0 : i32
    %c0_i32_0 = arith.constant 0 : i32
    %c0_i32_1 = arith.constant 0 : i32
    return %c0_i32, %c0_i32_0 : i32, i32
  }
  func.func @transform_4(%arg0: i32) -> (i32, i32) {
    %c0_i32 = arith.constant 0 : i32
    %c0_i32_0 = arith.constant 0 : i32
    %c0_i32_1 = arith.constant 0 : i32
    return %c0_i32, %c0_i32_0 : i32, i32
  }
  func.func @transform_5(%arg0: i32) -> (i32, i32) {
    %c0_i32 = arith.constant 0 : i32
    %c0_i32_0 = arith.constant 0 : i32
    %c0_i32_1 = arith.constant 0 : i32
    return %c0_i32, %c0_i32_0 : i32, i32
  }
  func.func @transform_6(%arg0: i32) -> (i32, i32, i32) {
    %c0_i32 = arith.constant 0 : i32
    %c0_i32_0 = arith.constant 0 : i32
    %c0_i32_1 = arith.constant 0 : i32
    return %arg0, %c0_i32, %c0_i32_0 : i32, i32, i32
  }
}

</mosaic_0001>

<bundles_post_ra>
// kernel: tpu_custom_call.1
= control target key start
LH: loop header
LB: loop body
LE: loop exit
PB: predicated region body
PF: predicated region fallthrough
CT: control target
= control target key end

     0   :  { %11 = vsyncpa [#allocation3], 0  ;;  %s2205_s0 = inlined_call_operand.hbm [shape: f32[2,16,128], index: 0, kind: input, shape index: {}]   ;;  %s2206_s1 = inlined_call_operand.hbm [shape: f32[2,16,16], index: 1, kind: input, shape index: {}]   ;;  %s2207_s2 = inlined_call_operand.hbm [shape: f32[384,128], index: 2, kind: input, shape index: {}]   ;;  %s2208_s3 = inlined_call_operand.vmem [shape: f32[1,128], index: 3, kind: input, shape index: {}]   ;;  %s2209_s4 = inlined_call_operand.hbm [shape: f32[384,128], index: 4, kind: input, shape index: {}]   ;;  %s2210_s5 = inlined_call_operand.vmem [shape: f32[1,128], index: 5, kind: input, shape index: {}]   ;;  %s2211_s6 = inlined_call_operand.hbm [shape: f32[2,16,128], index: 6, kind: output, shape index: {}]  }
   0x1   :  { %13 = vsyncpa [#allocation3 + $0x1], 0 }
   0x2   :  { %14 = vsyncpa [#allocation6], 0 }
   0x3   :  { %15 = vsyncpa [#allocation9], 0 }
   0x4   :  { %16 = vsyncpa [#allocation4], 0 }
   0x5   :  { %18 = vsyncpa [#allocation4 + $0x1], 0  ;;  %s1883_s21 = smov 0   ;;  %s1885_s22 = smov 0  }
   0x6   :  { %s1887_s23 = smov 0   ;;  %s1889_s24 = smov 0  }
   0x7 LB: > { %s1904_s25 = sadd.s32 4294967295, %s1837_s24   ;;  %s1166_s26 = sadd.s32 4294967294, %s1837_s24   ;;  %s1837_s24 = sphi %s1889_s24, %s2234_s24   ;;  %s1833_s23 = sphi %s1887_s23, %s2233_s23   ;;  %s1829_s22 = sphi %s1885_s22, %s2232_s22   ;;  %s1825_s21 = sphi %s1883_s21, %s2231_s21  }
   0x8   : > { %p44_p0 = scmp.ne.s32.totalorder %s1829_s22, %s1825_s21  ;;  %p2212_p1 = scmp.eq.s32.totalorder %s1904_s25, 0 }
   0x9   : > { %p179_p3 = scmp.eq.s32.totalorder %s1166_s26, 1  ;;  %p1167_p5 = scmp.ge.s32.totalorder %s1837_s24, 1 }
   0xa   : > { %p1913_p4 = por %p2212_p1, %p44_p0  ;;  %p186_p7 = scmp.lt.s32.totalorder %s1837_s24, 3 }
   0xb   : > { %p1918_p6 = por %p179_p3, %p44_p0  ;;  %s1839_s30 = smov [#allocation5]  }
   0xc   : > { %s2215_s27 = scalar_select %p1913_p4, 1, 0 }
   0xd   : > { %s2216_s28 = scalar_select %p1918_p6, 1, 0 }
   0xe   : > { %p1923_p8 = pnand %p1167_p5, %p186_p7  ;;  %s198_s7 = sshll.u32 %s1839_s30, 4  ;;  %s1927_s7 = int_to_ptr.vmem [resolvable:$true] %s198_s7 }
   0xf   : > { %s1840_s9 = smov [#allocation7]   ;;  %s1841_s11 = smov [#allocation8]  }
  0x10   : > { %s2217_s29 = scalar_select %p1923_p8, 1, 0 }
  0x11   : > { %p1584_p9 = pneg %p1923_p8  ;;  %s211_s10 = sshll.u32 %s1840_s9, 4  ;;  %s1938_s10 = int_to_ptr.vmem [resolvable:$true] %s211_s10 }
  0x12   : > { %s1940_s12 = sshll.u32 %s1841_s11, 4  ;;  %s1649_s15 = scalar_lea.hbm %s2206_s1, 512  ;;  %s228_s12 = int_to_ptr.vmem [resolvable:$true] %s1940_s12 }
  0x13   : > { %p1934_p11 = pnand %p1584_p9, %p2212_p1  ;;  %p1650_p12 = scmp.ne.s32.totalorder %s2206_s1, %s1649_s15 }
  0x14   : > { %p1656_p5 = scmp.lt.u32.totalorder %s1649_s15, %s2206_s1 }
  0x15   : > { %p1950_p13 = pneg %p1934_p11 }
  0x17   : > { %p1652_p0 = pnand %p1950_p13, %p1650_p12 }
  0x19   : > { %p1653_p3 = pneg %p1652_p0 }
  0x1b   : > { %p1658_p7 = pnand %p1656_p5, %p1653_p3 }
  0x1d   : > { %1661 = shalt.err (!%p1658_p7)
}
  0x1e   : > { %s1662_s26 = scalar_lea.vmem %s1927_s7, 512  ;;  %p1670_p2 = scmp.lt.s32.totalorder %s1927_s7, %s1927_s7 }
  0x1f   : > { %p1663_p9 = scmp.ne.s32.totalorder %s1927_s7, %s1662_s26  ;;  %p1671_p6 = scmp.lt.s32.totalorder %s1662_s26, %s1662_s26 }
  0x21   : > { %p1665_p10 = pnand %p1663_p9, %p1950_p13  ;;  %p1672_p12 = por %p1671_p6, %p1670_p2 }
  0x23   : > { %p1666_p1 = pneg %p1665_p10 }
  0x25   : > { %p1673_p0 = pnand %p1672_p12, %p1666_p1 }
  0x27   : > { %1676 = shalt.err (!%p1673_p0)
}
  0x28   : > { %s1842_s30 = smov 128   ;;  %s1843_s9 = smov 8  }
  0x29   : > { %1587 = dma.hbm_to_vmem [thread:$0]  (!%p1934_p11), %s2206_s1, 512, %s1927_s7, [#allocation6], %s1842_s30, %s1842_s30, %s1843_s9  }
  0x2a   : > { %s1677_s16 = scalar_lea.hbm %s2207_s2, 6144 }
  0x2b   : > { %p1678_p1 = scmp.ne.s32.totalorder %s2207_s2, %s1677_s16  ;;  %p1684_p10 = scmp.lt.u32.totalorder %s1677_s16, %s2207_s2 }
  0x2d   : > { %p1680_p2 = pnand %p1678_p1, %p1950_p13 }
  0x2f   : > { %p1681_p6 = pneg %p1680_p2 }
  0x31   : > { %p1686_p3 = pnand %p1684_p10, %p1681_p6 }
  0x33   : > { %1689 = shalt.err (!%p1686_p3)
}
  0x34   : > { %s1690_s7 = scalar_lea.vmem %s1938_s10, 6144  ;;  %p1698_p12 = scmp.lt.s32.totalorder %s1938_s10, %s1938_s10 }
  0x35   : > { %p1691_p5 = scmp.ne.s32.totalorder %s1938_s10, %s1690_s7  ;;  %p1699_p0 = scmp.lt.s32.totalorder %s1690_s7, %s1690_s7 }
  0x37   : > { %p1693_p7 = pnand %p1691_p5, %p1950_p13  ;;  %p1700_p1 = por %p1699_p0, %p1698_p12 }
  0x39   : > { %p1694_p9 = pneg %p1693_p7 }
  0x3b   : > { %p1701_p2 = pnand %p1700_p1, %p1694_p9 }
  0x3d   : > { %1704 = shalt.err (!%p1701_p2)
}
  0x3e   : > { %1590 = dma.hbm_to_vmem [thread:$0]  (!%p1934_p11), %s2207_s2, 6144, %s1938_s10, [#allocation6], %s1842_s30, %s1842_s30, %s1843_s9  }
  0x3f   : > { %s1705_s16 = scalar_lea.hbm %s2209_s4, 6144 }
  0x40   : > { %p1706_p6 = scmp.ne.s32.totalorder %s2209_s4, %s1705_s16  ;;  %p1712_p5 = scmp.lt.u32.totalorder %s1705_s16, %s2209_s4 }
  0x42   : > { %p1708_p10 = pnand %p1706_p6, %p1950_p13 }
  0x44   : > { %p1709_p3 = pneg %p1708_p10 }
  0x46   : > { %p1714_p7 = pnand %p1712_p5, %p1709_p3 }
  0x48   : > { %1717 = shalt.err (!%p1714_p7)
}
  0x49   : > { %s1718_s7 = scalar_lea.vmem %s228_s12, 6144  ;;  %p1726_p1 = scmp.lt.s32.totalorder %s228_s12, %s228_s12 }
  0x4a   : > { %p1719_p9 = scmp.ne.s32.totalorder %s228_s12, %s1718_s7  ;;  %p1727_p2 = scmp.lt.s32.totalorder %s1718_s7, %s1718_s7 }
  0x4c   : > { %p1721_p12 = pnand %p1719_p9, %p1950_p13  ;;  %p1728_p4 = por %p1727_p2, %p1726_p1 }
  0x4e   : > { %p1722_p0 = pneg %p1721_p12 }
  0x50   : > { %p1729_p8 = pnand %p1728_p4, %p1722_p0 }
  0x52   : > { %1732 = shalt.err (!%p1729_p8)
}
  0x53   : > { %1593 = dma.hbm_to_vmem [thread:$0]  (!%p1934_p11), %s2209_s4, 6144, %s228_s12, [#allocation9], %s1842_s30, %s1842_s30, %s1843_s9  }
  0x54   : > { %s2023_s18 = sadd.s32 1, %s1837_s24   ;;  %s31_s13 = sadd.s32 1, %s1833_s23 }
  0x55   : > { %s28_s8 = ssub.s32 %s1837_s24, %s2023_s18  ;;  %p38_p8 = scmp.ne.s32.totalorder %s1833_s23, %s1829_s22 }
  0x56   : > { %p29_p4 = scmp.eq.s32.totalorder %s28_s8, 0  ;;  %p39_p13 = scmp.eq.s32.totalorder %s1837_s24, 0 }
  0x57   : > { %p1605_p6 = scmp.lt.s32.totalorder %s1837_s24, 2  ;;  %p2220_p3 = scmp.eq.s32.totalorder %s1904_s25, 1 }
  0x58   : > { %s2033_s14 = scalar_select %p29_p4, %s1833_s23, %s31_s13  }
  0x59   : > { %p40_p10 = por %p39_p13, %p38_p8  ;;  %p2037_p5 = por %p2220_p3, %p38_p8 }
  0x5a   : > { %s244_s16 = sand.u32 1, %s1833_s23   ;;  %s1196_s17 = sshll.u32 %s1837_s24, 8 }
  0x5b   : > { %s1172_s12 = sshll.u32 %s244_s16, 4  ;;  %s2046_s26 = scalar_lea.hbm %s2205_s0, %s1196_s17 }
  0x5c   : > { %s248_s7 = scalar_lea.vmem [#allocation2], %s1172_s12  ;;  %p2048_p11 = pnand %p1605_p6, %p40_p10 }
  0x5d   : > { %s255_s10 = sshll.u32 %s248_s7, 4  ;;  %s2054_s8 = scalar_lea.sflag [#allocation3], %s244_s16  ;;  %s2052_s10 = int_to_ptr.vmem [resolvable:$true] %s255_s10 }
  0x5e   : > { %s1733_s13 = scalar_lea.hbm %s2046_s26, 256  ;;  %p1735_p9 = pneg %p2048_p11 }
  0x5f   : > { %p1734_p7 = scmp.ne.s32.totalorder %s2046_s26, %s1733_s13  ;;  %s1738_s19 = scalar_lea.hbm %s2205_s0, 512 }
  0x60   : > { %p1739_p1 = scmp.lt.u32.totalorder %s2046_s26, %s2205_s0  ;;  %p1740_p2 = scmp.lt.u32.totalorder %s1738_s19, %s1733_s13 }
  0x61   : > { %p1736_p12 = pnand %p1735_p9, %p1734_p7  ;;  %p1742_p8 = scmp.lt.u32.totalorder %s1733_s13, %s2046_s26 }
  0x62   : > { %p1741_p4 = por %p1740_p2, %p1739_p1 }
  0x63   : > { %p1737_p0 = pneg %p1736_p12 }
  0x64   : > { %p1743_p13 = por %p1742_p8, %p1741_p4 }
  0x66   : > { %p1744_p6 = pnand %p1743_p13, %p1737_p0 }
  0x68   : > { %1747 = shalt.err (!%p1744_p6)
}
  0x69   : > { %s1748_s16 = scalar_lea.vmem %s2052_s10, 256  ;;  %s1844_s17 = smov [#allocation2]  }
  0x6a   : > { %p1749_p10 = scmp.ne.s32.totalorder %s2052_s10, %s1748_s16  ;;  %s1753_s12 = sshll.u32 %s1844_s17, 4  ;;  %s1754_s12 = int_to_ptr.vmem [resolvable:$false] %s1753_s12 }
  0x6b   : > { %s1755_s20 = scalar_lea.vmem %s1754_s12, 512  ;;  %p1756_p12 = scmp.lt.s32.totalorder %s2052_s10, %s1754_s12 }
  0x6c   : > { %p1751_p3 = pnand %p1749_p10, %p1735_p9  ;;  %p1757_p1 = scmp.lt.s32.totalorder %s1755_s20, %s1748_s16 }
  0x6e   : > { %p1752_p7 = pneg %p1751_p3  ;;  %p1758_p2 = por %p1757_p1, %p1756_p12 }
  0x70   : > { %p1759_p4 = pnand %p1758_p2, %p1752_p7 }
  0x72   : > { %1762 = shalt.err (!%p1759_p4)
}
  0x73   : > { %1597 = dma.hbm_to_vmem [thread:$0]  (!%p2048_p11), %s2046_s26, 256, %s2052_s10, %s2054_s8, %s1842_s30, %s1842_s30, %s1843_s9  }
  0x74   : > { %p2223_p9 = scmp.ne.s32.totalorder %s2217_s29, 0 }
  0x75   : > { %s2088_s13 = sand.u32 (!%p2223_p9), 1, %s1829_s22   ;;  %p2224_p0 = scmp.ne.s32.totalorder (!%p2223_p9), %s2215_s27, 0 }
  0x76   : > { %267 = sbr.rel (%p2223_p9) target bundleno = 1037 (0x40d), region = 44  ;;  %s1176_s19 = sshll.u32 (!%p2223_p9), %s2088_s13, 4 }
  0x77   : > { %s270_s7 = scalar_lea.sflag (!%p2223_p9), [#allocation3], %s2088_s13  ;;  %s273_s11 = scalar_lea.vmem (!%p2223_p9), [#allocation2], %s1176_s19 }
  0x7d   : > { %1808 = dma.done.wait (%p2224_p0), %s270_s7, 256  }
  0x7e   : > { %1810 = vsyncadd (%p2224_p0), %s270_s7, 4294967040  ;;  %p2225_p11 = scmp.eq.s32.totalorder %s1904_s25, 0 }
  0x80   : > { %1812 = dma.done.wait (%p2225_p11), [#allocation6], 6656   ;;  %p2226_p8 = pmov %p2225_p11 }
  0x82   : > { %1814 = vsyncadd (%p2226_p8), [#allocation6], 4294960640  ;;  %p2227_p13 = pmov %p2226_p8 }
  0x83   : > { %p2228_p6 = pmov %p2226_p8 }
  0x84   : > { %1816 = dma.done.wait (%p2227_p13), [#allocation9], 6144  }
  0x85   : > { %1818 = vsyncadd (%p2228_p6), [#allocation9], 4294961152  ;;  %vm321_vm0 = vcmask 130048   ;;  %v2106_v0 = vld [vmem:[%s273_s11] sm:$0xff]  ;;  %v2108_v1 = vld [vmem:[%s273_s11 + $0x8] sm:$0xff]  ;;  %s313_s26 = scalar_lea.vmem [#allocation10], %s1176_s19 }
  0x86   : > { %v2110_v2 = vld [vmem:[#allocation5] sm:$0xff]  ;;  %v1424_v3 = vpack.c.bf16 %v2108_v1, %v2106_v0  ;;  %v2116_v4 = vld [vmem:[#allocation5 + $0x10] sm:$0xff]  ;;  %v2118_v5 = vld [vmem:[#allocation5 + $0x8] sm:$0xff]  ;;  %s1064_s10 = sshll.u32 %s313_s26, 4  ;;  %s1197_s8 = sshll.u32 %s1904_s25, 8  ;;  %s2155_s10 = int_to_ptr.vmem [resolvable:$true] %s1064_s10 }
  0x87   : > { %1330 = vmatprep.mubr.msk.f32.mxu0 %vm321_vm0, %v2110_v2  ;;  %1337 = vmatprep.mubr.msk.f32.mxu1 %vm321_vm0, %v2116_v4  ;;  %v500_v6 = vld [vmem:[#allocation7 + $0x80] sm:$0xff]  ;;  %v501_v7 = vld [vmem:[#allocation7 + $0x88] sm:$0xff]  ;;  %v502_v11 = vld [vmem:[#allocation7 + $0x90] sm:$0xff]  ;;  %s2160_s12 = scalar_lea.hbm %s2211_s6, %s1197_s8  ;;  %s1051_s20 = scalar_lea.sflag [#allocation4], %s2088_s13 }
  0x88   : > { %v484_v8 = vld [vmem:[#allocation7] sm:$0xff]  ;;  %1425 = vmatprep.subr.bf16.mxu0 %v1424_v3  ;;  %1429 = vmatprep.subr.bf16.mxu1 %v1424_v3  ;;  %v1432_v9 = vpack.c.bf16 %v501_v7, %v500_v6  ;;  %v485_v10 = vld [vmem:[#allocation7 + $0x8] sm:$0xff]  ;;  %v503_v12 = vld [vmem:[#allocation7 + $0x98] sm:$0xff]  ;;  %s1763_s19 = scalar_lea.vmem %s2155_s10, 256  ;;  %s1845_s25 = smov [#allocation10]  }
  0x89   : > { %1427 = vmatpush3.bf16.msra.mxu0 %v1424_v3  ;;  %1431 = vmatpush3.bf16.msra.mxu1 %v1424_v3  ;;  %v2122_v13 = vld [vmem:[#allocation5 + $0x18] sm:$0xff]  ;;  %v1434_v14 = vpack.c.bf16 %v485_v10, %v484_v8  ;;  %v516_v15 = vld [vmem:[#allocation7 + $0x100] sm:$0xff]  ;;  %v517_v16 = vld [vmem:[#allocation7 + $0x108] sm:$0xff]  ;;  %v1436_v17 = vpack.c.bf16 %v503_v12, %v502_v11  ;;  %p1764_p10 = scmp.ne.s32.totalorder %s2155_s10, %s1763_s19  ;;  %s1767_s7 = sshll.u32 %s1845_s25, 4  ;;  %s1768_s7 = int_to_ptr.vmem [resolvable:$false] %s1767_s7 }
  0x8a   : > { %1433 = vmatprep.subr.bf16.mxu0 %v1432_v9  ;;  %v1464_v18 = vpack.c.bf16 %v517_v16, %v516_v15  ;;  %v486_v19 = vld [vmem:[#allocation7 + $0x10] sm:$0xff]  ;;  %v487_v20 = vld [vmem:[#allocation7 + $0x18] sm:$0xff]  ;;  %v504_v21 = vld [vmem:[#allocation7 + $0xa0] sm:$0xff]  ;;  %s1769_s11 = scalar_lea.vmem %s1768_s7, 512  ;;  %p1770_p12 = scmp.lt.s32.totalorder %s2155_s10, %s1768_s7 }
  0x8b   : > { %v505_v22 = vld [vmem:[#allocation7 + $0xa8] sm:$0xff]  ;;  %v518_v23 = vld [vmem:[#allocation7 + $0x110] sm:$0xff]  ;;  %v519_v24 = vld [vmem:[#allocation7 + $0x118] sm:$0xff]  ;;  %v1438_v26 = vpack.c.bf16 %v487_v20, %v486_v19  ;;  %p1765_p3 = pnand %p1764_p10, %p2037_p5  ;;  %p1771_p1 = scmp.lt.s32.totalorder %s1769_s11, %s1763_s19 }
  0x8c   : > { %1331 = vmatmul.mubr.msk.f32.vlgmr.msra.gmra.mrb[0].mxu0 %vm321_vm0, %v2118_v5  ;;  %1338 = vmatmul.mubr.msk.f32.vlgmr.msra.gmra.mrb[0].mxu1 %vm321_vm0, %v2122_v13  ;;  %v1468_v25 = vpack.c.bf16 %v519_v24, %v518_v23  ;;  %v520_v27 = vld [vmem:[#allocation7 + $0x120] sm:$0xff]  ;;  %v521_v28 = vld [vmem:[#allocation7 + $0x128] sm:$0xff]  ;;  %v1440_v29 = vpack.c.bf16 %v505_v22, %v504_v21  ;;  %v506_v32 = vld [vmem:[#allocation7 + $0xb0] sm:$0xff] }
  0x8d   : > { %1435 = vmatpush3.bf16.msra.mxu0 %v1434_v14  ;;  %1465 = vmatprep.subr.bf16.mxu1 %v1464_v18  ;;  %v488_v30 = vld [vmem:[#allocation7 + $0x20] sm:$0xff]  ;;  %v489_v31 = vld [vmem:[#allocation7 + $0x28] sm:$0xff]  ;;  %v507_v33 = vld [vmem:[#allocation7 + $0xb8] sm:$0xff]  ;;  %v1472_v34 = vpack.c.bf16 %v521_v28, %v520_v27  ;;  %p1766_p7 = pneg %p1765_p3  ;;  %p1772_p2 = por %p1771_p1, %p1770_p12 }
  0x8e   : > { %1437 = vmatprep.subr.bf16.mxu0 %v1436_v17  ;;  %1467 = vmatpush3.bf16.msra.mxu1 %v1464_v18  ;;  %v522_v35 = vld [vmem:[#allocation7 + $0x130] sm:$0xff]  ;;  %v523_v36 = vld [vmem:[#allocation7 + $0x138] sm:$0xff]  ;;  %v1442_v37 = vpack.c.bf16 %v489_v31, %v488_v30  ;;  %v1444_v38 = vpack.c.bf16 %v507_v33, %v506_v32  ;;  %v508_v41 = vld [vmem:[#allocation7 + $0xc0] sm:$0xff] }
  0x8f   : > { %1469 = vmatprep.subr.bf16.mxu1 %v1468_v25  ;;  %603 = vmatprep.mubr.f32.mxu0 %v2106_v0  ;;  %v490_v39 = vld [vmem:[#allocation7 + $0x30] sm:$0xff]  ;;  %v491_v40 = vld [vmem:[#allocation7 + $0x38] sm:$0xff]  ;;  %v509_v42 = vld [vmem:[#allocation7 + $0xc8] sm:$0xff]  ;;  %v1476_v43 = vpack.c.bf16 %v523_v36, %v522_v35  ;;  %p1773_p4 = pnand %p1772_p2, %p1766_p7 }
  0x90   : > { %v524_v44 = vld [vmem:[#allocation7 + $0x140] sm:$0xff]  ;;  %v525_v45 = vld [vmem:[#allocation7 + $0x148] sm:$0xff]  ;;  %v1446_v46 = vpack.c.bf16 %v491_v40, %v490_v39  ;;  %v1448_v47 = vpack.c.bf16 %v509_v42, %v508_v41  ;;  %v510_v50 = vld [vmem:[#allocation7 + $0xd0] sm:$0xff] }
  0x91   : > { %1439 = vmatpush3.bf16.msra.mxu0 %v1438_v26  ;;  %v492_v48 = vld [vmem:[#allocation7 + $0x40] sm:$0xff]  ;;  %v493_v49 = vld [vmem:[#allocation7 + $0x48] sm:$0xff]  ;;  %v511_v51 = vld [vmem:[#allocation7 + $0xd8] sm:$0xff]  ;;  %v1480_v52 = vpack.c.bf16 %v525_v45, %v524_v44 }
  0x92   : > { %1441 = vmatprep.subr.bf16.mxu0 %v1440_v29  ;;  %1471 = vmatpush3.bf16.msra.mxu1 %v1468_v25  ;;  %v526_v53 = vld [vmem:[#allocation7 + $0x150] sm:$0xff]  ;;  %v527_v54 = vld [vmem:[#allocation7 + $0x158] sm:$0xff]  ;;  %v1450_v55 = vpack.c.bf16 %v493_v49, %v492_v48  ;;  %v1452_v56 = vpack.c.bf16 %v511_v51, %v510_v50  ;;  %v512_v59 = vld [vmem:[#allocation7 + $0xe0] sm:$0xff] }
  0x93   : > { %1473 = vmatprep.subr.bf16.mxu1 %v1472_v34  ;;  %v494_v57 = vld [vmem:[#allocation7 + $0x50] sm:$0xff]  ;;  %v495_v58 = vld [vmem:[#allocation7 + $0x58] sm:$0xff]  ;;  %v513_v60 = vld [vmem:[#allocation7 + $0xe8] sm:$0xff]  ;;  %v1484_v61 = vpack.c.bf16 %v527_v54, %v526_v53 }
  0x94   : > { %v528_v62 = vld [vmem:[#allocation7 + $0x160] sm:$0xff]  ;;  %v529_v63 = vld [vmem:[#allocation7 + $0x168] sm:$0xff]  ;;  %v1454_v3 = vpack.c.bf16 %v495_v58, %v494_v57  ;;  %v1456_v6 = vpack.c.bf16 %v513_v60, %v512_v59  ;;  %v514_v9 = vld [vmem:[#allocation7 + $0xf0] sm:$0xff] }
  0x95   : > { %1443 = vmatpush3.bf16.msra.mxu0 %v1442_v37  ;;  %v496_v7 = vld [vmem:[#allocation7 + $0x60] sm:$0xff]  ;;  %v497_v8 = vld [vmem:[#allocation7 + $0x68] sm:$0xff]  ;;  %v515_v10 = vld [vmem:[#allocation7 + $0xf8] sm:$0xff]  ;;  %v1488_v11 = vpack.c.bf16 %v529_v63, %v528_v62 }
  0x96   : > { %1445 = vmatprep.subr.bf16.mxu0 %v1444_v38  ;;  %1475 = vmatpush3.bf16.msra.mxu1 %v1472_v34  ;;  %v1458_v12 = vpack.c.bf16 %v497_v8, %v496_v7  ;;  %v1460_v14 = vpack.c.bf16 %v515_v10, %v514_v9  ;;  %v498_v15 = vld [vmem:[#allocation7 + $0x70] sm:$0xff]  ;;  %v499_v16 = vld [vmem:[#allocation7 + $0x78] sm:$0xff]  ;;  %v1185_v28 = vld [vmem:[%s2208_s3] ss:$0 sm:$0xff] }
  0x97   : > { %1477 = vmatprep.subr.bf16.mxu1 %v1476_v43  ;;  %v1462_v17 = vpack.c.bf16 %v499_v16, %v498_v15  ;;  %v530_v18 = vld [vmem:[#allocation7 + $0x170] sm:$0xff]  ;;  %v531_v19 = vld [vmem:[#allocation7 + $0x178] sm:$0xff]  ;;  %v857_v37 = vld [vmem:[#allocation8 + $0x80] sm:$0xff] }
  0x98   : > { %v1492_v20 = vpack.c.bf16 %v531_v19, %v530_v18  ;;  %v858_v38 = vld [vmem:[#allocation8 + $0x88] sm:$0xff]  ;;  %v841_v44 = vld [vmem:[#allocation8] sm:$0xff]  ;;  %v860_v48 = vld [vmem:[#allocation8 + $0x98] sm:$0xff] }
  0x99   : > { %1447 = vmatpush3.bf16.msra.mxu0 %v1446_v46  ;;  %v874_v39 = vld [vmem:[#allocation8 + $0x108] sm:$0xff]  ;;  %v875_v49 = vld [vmem:[#allocation8 + $0x110] sm:$0xff]  ;;  %v876_v50 = vld [vmem:[#allocation8 + $0x118] sm:$0xff] }
  0x9a   : > { %1449 = vmatprep.subr.bf16.mxu0 %v1448_v47  ;;  %1479 = vmatpush3.bf16.msra.mxu1 %v1476_v43  ;;  %v1504_v43 = vpack.c.bf16 %v858_v38, %v857_v37  ;;  %v842_v45 = vld [vmem:[#allocation8 + $0x8] sm:$0xff]  ;;  %v859_v47 = vld [vmem:[#allocation8 + $0x90] sm:$0xff]  ;;  %v844_v54 = vld [vmem:[#allocation8 + $0x18] sm:$0xff]  ;;  %v1540_v57 = vpack.c.bf16 %v876_v50, %v875_v49 }
  0x9b   : > { %1481 = vmatprep.subr.bf16.mxu1 %v1480_v52  ;;  %v1506_v51 = vpack.c.bf16 %v842_v45, %v841_v44  ;;  %v843_v53 = vld [vmem:[#allocation8 + $0x10] sm:$0xff]  ;;  %v877_v58 = vld [vmem:[#allocation8 + $0x120] sm:$0xff]  ;;  %v878_v59 = vld [vmem:[#allocation8 + $0x128] sm:$0xff] }
  0x9c   : > { %v1510_v60 = vpack.c.bf16 %v844_v54, %v843_v53  ;;  %v845_v62 = vld [vmem:[#allocation8 + $0x20] sm:$0xff]  ;;  %v846_v63 = vld [vmem:[#allocation8 + $0x28] sm:$0xff]  ;;  %v1544_v7 = vpack.c.bf16 %v878_v59, %v877_v58  ;;  %v879_v8 = vld [vmem:[#allocation8 + $0x130] sm:$0xff] }
  0x9d   : > { %1451 = vmatpush3.bf16.msra.mxu0 %v1450_v55  ;;  %v861_v55 = vld [vmem:[#allocation8 + $0xa0] sm:$0xff]  ;;  %v880_v9 = vld [vmem:[#allocation8 + $0x138] sm:$0xff]  ;;  %v847_v10 = vld [vmem:[#allocation8 + $0x30] sm:$0xff] }
  0x9e   : > { %1453 = vmatprep.subr.bf16.mxu0 %v1452_v56  ;;  %1483 = vmatpush3.bf16.msra.mxu1 %v1480_v52  ;;  %v1508_v52 = vpack.c.bf16 %v860_v48, %v859_v47  ;;  %v862_v56 = vld [vmem:[#allocation8 + $0xa8] sm:$0xff]  ;;  %v1548_v15 = vpack.c.bf16 %v880_v9, %v879_v8  ;;  %v881_v16 = vld [vmem:[#allocation8 + $0x140] sm:$0xff]  ;;  %v855_v45 = vld [vmem:[#allocation8 + $0x70] sm:$0xff] }
  0x9f   : > { %1485 = vmatprep.subr.bf16.mxu1 %v1484_v61  ;;  %v853_v38 = vld [vmem:[#allocation8 + $0x60] sm:$0xff]  ;;  %v887_v48 = vld [vmem:[#allocation8 + $0x170] sm:$0xff]  ;;  %v888_v49 = vld [vmem:[#allocation8 + $0x178] sm:$0xff] }
  0xa0   : > { %v1564_v50 = vpack.c.bf16 %v888_v49, %v887_v48  ;;  %v1190_v58 = vld [vmem:[%s2210_s5] ss:$0 sm:$0xff] }
  0xa1   : > { %1455 = vmatpush3.bf16.msra.mxu0 %v1454_v3  ;;  %v863_v3 = vld [vmem:[#allocation8 + $0xb0] sm:$0xff] }
  0xa2   : > { %1457 = vmatprep.subr.bf16.mxu0 %v1456_v6  ;;  %1487 = vmatpush3.bf16.msra.mxu1 %v1484_v61  ;;  %v1512_v61 = vpack.c.bf16 %v862_v56, %v861_v55  ;;  %v864_v6 = vld [vmem:[#allocation8 + $0xb8] sm:$0xff] }
  0xa3   : > { %1489 = vmatprep.subr.bf16.mxu1 %v1488_v11 }
  0xa5   : > { %1459 = vmatpush3.bf16.msra.mxu0 %v1458_v12  ;;  %v865_v12 = vld [vmem:[#allocation8 + $0xc0] sm:$0xff] }
  0xa6   : > { %1461 = vmatprep.subr.bf16.mxu0 %v1460_v14  ;;  %1491 = vmatpush3.bf16.msra.mxu1 %v1488_v11  ;;  %v848_v11 = vld [vmem:[#allocation8 + $0x38] sm:$0xff]  ;;  %v866_v14 = vld [vmem:[#allocation8 + $0xc8] sm:$0xff] }
  0xa7   : > { %1493 = vmatprep.subr.bf16.mxu1 %v1492_v20  ;;  %v1518_v18 = vpack.c.bf16 %v848_v11, %v847_v10  ;;  %v1520_v19 = vpack.c.bf16 %v866_v14, %v865_v12 }
  0xa9   : > { %1463 = vmatpush3.bf16.msra.mxu0 %v1462_v17  ;;  %v882_v17 = vld [vmem:[#allocation8 + $0x148] sm:$0xff] }
  0xaa   : > { %1495 = vmatpush3.bf16.msra.mxu1 %v1492_v20  ;;  %v849_v20 = vld [vmem:[#allocation8 + $0x40] sm:$0xff] }
 0x15f   : > { %v1332_v21 = vpop.f32.mrb[0].mxu0  ;;  %v1339_v22 = vpop.f32.mrb[0].mxu1 }
 0x160   : > { %v394_v23 = vpop.f32.mrb[1].mxu0  ;;  %v475_v24 = vpop.f32.mrb[1].mxu1 }
 0x161   : > { %604 = vmatmul.mubr.f32.vlgmr.msra.gmra.mrb[2].mxu0 %v394_v23  ;;  %1372 = vmatprep.mubr.f32.mxu1 %v475_v24  ;;  %v868_v23 = vld [vmem:[#allocation8 + $0xd8] sm:$0xff]  ;;  %v1552_v24 = vpack.c.bf16 %v882_v17, %v881_v16 }
 0x162   : > { %608 = vmatprep.mubr.f32.mxu0 %v2108_v1  ;;  %1373 = vmatmul.mubr.f32.vlgmr.msra.gmra.mrb[2].mxu1 %v1339_v22  ;;  %v867_v22 = vld [vmem:[#allocation8 + $0xd0] sm:$0xff] }
 0x163   : > { %1379 = vmatprep.mubr.msk.f32.mxu1 %vm321_vm0, %v2110_v2 }
 0x165   : > { %609 = vmatmul.mubr.f32.gmra.mrb[4].mxu0 %v1332_v21  ;;  %v850_v21 = vld [vmem:[#allocation8 + $0x48] sm:$0xff] }
 0x166   : > { %1386 = vmatprep.mubr.msk.f32.mxu0 %vm321_vm0, %v2116_v4  ;;  %v873_v4 = vld [vmem:[#allocation8 + $0x100] sm:$0xff] }
 0x167   : > { %v1536_v46 = vpack.c.bf16 %v874_v39, %v873_v4  ;;  %v854_v4 = vld [vmem:[#allocation8 + $0x68] sm:$0xff]  ;;  %v871_v39 = vld [vmem:[#allocation8 + $0xf0] sm:$0xff] }
 0x234   : > { %v1238_v25 = vpop.f32.mrb[2].mxu0 }
 0x235   : > { %v1239_v26 = vpop.f32.mrb[3].mxu0  ;;  %v1374_v27 = vpop.f32.mrb[2].mxu1 }
 0x236   : > { %v1240_v29 = vadd.f32 %v1239_v26, %v1238_v25  ;;  %v680_v30 = vpop.f32.mrb[3].mxu1  ;;  %v883_v25 = vld [vmem:[#allocation8 + $0x150] sm:$0xff]  ;;  %v884_v26 = vld [vmem:[#allocation8 + $0x158] sm:$0xff] }
 0x238   : > { %v1241_v31 = vpop.f32.mrb[4].mxu0  ;;  %v606_v32 = vadd.f32 %v1240_v29, %v1185_v28  ;;  %v851_v29 = vld [vmem:[#allocation8 + $0x50] sm:$0xff] }
 0x239   : > { %v1242_v33 = vpop.f32.mrb[5].mxu0 }
 0x23a   : > { %v1243_v34 = vadd.f32 %v1242_v33, %v1241_v31  ;;  %v681_v35 = vadd.f32 %v680_v30, %v606_v32  ;;  %v852_v30 = vld [vmem:[#allocation8 + $0x58] sm:$0xff]  ;;  %v869_v31 = vld [vmem:[#allocation8 + $0xe0] sm:$0xff]  ;;  %v870_v32 = vld [vmem:[#allocation8 + $0xe8] sm:$0xff]  ;;  %v1556_v33 = vpack.c.bf16 %v884_v26, %v883_v25 }
 0x23b   : > { %v1528_v37 = vpack.c.bf16 %v870_v32, %v869_v31 }
 0x23c   : > { %v611_v36 = vadd.f32 %v1243_v34, %v1185_v28  ;;  %v689_v40 = vmax.f32 %v681_v35, 0.0  ;;  %v1524_v28 = vpack.c.bf16 %v868_v23, %v867_v22  ;;  %v885_v34 = vld [vmem:[#allocation8 + $0x160] sm:$0xff]  ;;  %v886_v35 = vld [vmem:[#allocation8 + $0x168] sm:$0xff] }
 0x23e   : > { %v2137_v2 = vadd.f32 %v1374_v27, %v611_v36  ;;  %v1522_v27 = vpack.c.bf16 %v850_v21, %v849_v20  ;;  %v1526_v36 = vpack.c.bf16 %v852_v30, %v851_v29 }
 0x240   : > { %v690_v41 = vmax.f32 %v2137_v2, 0.0 }
 0x242   : > { %v1496_v42 = vpack.c.bf16 %v690_v41, %v689_v40 }
 0x244   : > { %1497 = vmatprep.subr.bf16.mxu1 %v1496_v42  ;;  %1501 = vmatprep.subr.bf16.mxu0 %v1496_v42 }
 0x245   : > { %1499 = vmatpush3.bf16.msra.mxu1 %v1496_v42  ;;  %1503 = vmatpush3.bf16.msra.mxu0 %v1496_v42  ;;  %v1560_v42 = vpack.c.bf16 %v886_v35, %v885_v34 }
 0x246   : > { %1505 = vmatprep.subr.bf16.mxu1 %v1504_v43  ;;  %1537 = vmatprep.subr.bf16.mxu0 %v1536_v46  ;;  %v1530_v43 = vpack.c.bf16 %v854_v4, %v853_v38 }
 0x248   : > { %1380 = vmatmul.mubr.msk.f32.vlgmr.msra.gmra.mrb[4].mxu1 %vm321_vm0, %v2118_v5  ;;  %1387 = vmatmul.mubr.msk.f32.vlgmr.msra.gmra.mrb[6].mxu0 %vm321_vm0, %v2122_v13  ;;  %v1514_v5 = vpack.c.bf16 %v846_v63, %v845_v62  ;;  %v1516_v13 = vpack.c.bf16 %v864_v6, %v863_v3 }
 0x249   : > { %960 = vmatprep.mubr.f32.mxu1 %v689_v40  ;;  %1507 = vmatpush3.bf16.msra.mxu1 %v1506_v51  ;;  %v872_v40 = vld [vmem:[#allocation8 + $0xf8] sm:$0xff] }
 0x24a   : > { %1509 = vmatprep.subr.bf16.mxu1 %v1508_v52  ;;  %1539 = vmatpush3.bf16.msra.mxu0 %v1536_v46  ;;  %v1532_v44 = vpack.c.bf16 %v872_v40, %v871_v39  ;;  %v856_v46 = vld [vmem:[#allocation8 + $0x78] sm:$0xff] }
 0x24b   : > { %1541 = vmatprep.subr.bf16.mxu0 %v1540_v57  ;;  %v1534_v47 = vpack.c.bf16 %v856_v46, %v855_v45 }
 0x24d   : > { %1511 = vmatpush3.bf16.msra.mxu1 %v1510_v60 }
 0x24e   : > { %1513 = vmatprep.subr.bf16.mxu1 %v1512_v61  ;;  %1543 = vmatpush3.bf16.msra.mxu0 %v1540_v57 }
 0x24f   : > { %1545 = vmatprep.subr.bf16.mxu0 %v1544_v7 }
 0x251   : > { %1515 = vmatpush3.bf16.msra.mxu1 %v1514_v5 }
 0x252   : > { %1517 = vmatprep.subr.bf16.mxu1 %v1516_v13  ;;  %1547 = vmatpush3.bf16.msra.mxu0 %v1544_v7 }
 0x253   : > { %1549 = vmatprep.subr.bf16.mxu0 %v1548_v15 }
 0x255   : > { %1519 = vmatpush3.bf16.msra.mxu1 %v1518_v18 }
 0x256   : > { %1521 = vmatprep.subr.bf16.mxu1 %v1520_v19  ;;  %1551 = vmatpush3.bf16.msra.mxu0 %v1548_v15 }
 0x257   : > { %1553 = vmatprep.subr.bf16.mxu0 %v1552_v24 }
 0x259   : > { %1523 = vmatpush3.bf16.msra.mxu1 %v1522_v27 }
 0x25a   : > { %1525 = vmatprep.subr.bf16.mxu1 %v1524_v28  ;;  %1555 = vmatpush3.bf16.msra.mxu0 %v1552_v24 }
 0x25b   : > { %1557 = vmatprep.subr.bf16.mxu0 %v1556_v33 }
 0x25d   : > { %1527 = vmatpush3.bf16.msra.mxu1 %v1526_v36 }
 0x25e   : > { %1529 = vmatprep.subr.bf16.mxu1 %v1528_v37  ;;  %1559 = vmatpush3.bf16.msra.mxu0 %v1556_v33 }
 0x25f   : > { %1561 = vmatprep.subr.bf16.mxu0 %v1560_v42 }
 0x261   : > { %1531 = vmatpush3.bf16.msra.mxu1 %v1530_v43 }
 0x262   : > { %1533 = vmatprep.subr.bf16.mxu1 %v1532_v44  ;;  %1563 = vmatpush3.bf16.msra.mxu0 %v1560_v42 }
 0x263   : > { %1565 = vmatprep.subr.bf16.mxu0 %v1564_v50 }
 0x265   : > { %1535 = vmatpush3.bf16.msra.mxu1 %v1534_v47 }
 0x266   : > { %1567 = vmatpush3.bf16.msra.mxu0 %v1564_v50 }
 0x31b   : > { %v1381_v51 = vpop.f32.mrb[4].mxu1  ;;  %v1388_v52 = vpop.f32.mrb[6].mxu0 }
 0x31c   : > { %v757_v53 = vpop.f32.mrb[5].mxu1  ;;  %v832_v54 = vpop.f32.mrb[7].mxu0 }
 0x31d   : > { %961 = vmatmul.mubr.f32.vlgmr.msra.gmra.mrb[6].mxu1 %v757_v53  ;;  %1421 = vmatprep.mubr.f32.mxu0 %v832_v54 }
 0x31e   : > { %965 = vmatprep.mubr.f32.mxu1 %v690_v41  ;;  %1422 = vmatmul.mubr.f32.vlgmr.msra.gmra.mrb[8].mxu0 %v1388_v52 }
 0x321   : > { %966 = vmatmul.mubr.f32.gmra.mrb[8].mxu1 %v1381_v51 }
 0x3f0   : > { %v1302_v55 = vpop.f32.mrb[6].mxu1 }
 0x3f1   : > { %v1303_v56 = vpop.f32.mrb[7].mxu1  ;;  %v1423_v57 = vpop.f32.mrb[8].mxu0 }
 0x3f2   : > { %v1304_v59 = vadd.f32 %v1303_v56, %v1302_v55  ;;  %v1037_v60 = vpop.f32.mrb[9].mxu0 }
 0x3f4   : > { %v1305_v61 = vpop.f32.mrb[8].mxu1  ;;  %v963_v62 = vadd.f32 %v1304_v59, %v1190_v58 }
 0x3f5   : > { %v1306_v63 = vpop.f32.mrb[9].mxu1 }
 0x3f6   : > { %v1307_v3 = vadd.f32 %v1306_v63, %v1305_v61  ;;  %v1038_v2 = vadd.f32 %v1037_v60, %v963_v62 }
 0x3f8   : > { %v968_v41 = vadd.f32 %v1307_v3, %v1190_v58  ;;  %v1046_v6 = vadd.f32 %v1038_v2, %v2106_v0 }
 0x3fa   : > { %v1043_v7 = vadd.f32 %v1423_v57, %v968_v41  ;;  %1048 = vst [vmem:[%s313_s26] sm:$0xff] %v1046_v6 }
 0x3fc   : > { %v1047_v8 = vadd.f32 %v1043_v7, %v2108_v1 }
 0x3fe   : > { %1049 = vst [vmem:[%s313_s26 + $0x8] sm:$0xff] %v1047_v8 }
 0x3ff   : > { %1776 = shalt.err (!%p1773_p4)
}
 0x400   : > { %s1777_s27 = scalar_lea.hbm %s2160_s12, 256  ;;  %s1781_s9 = scalar_lea.hbm %s2211_s6, 512 }
 0x401   : > { %p1778_p9 = scmp.ne.s32.totalorder %s2160_s12, %s1777_s27  ;;  %p1782_p8 = scmp.lt.u32.totalorder %s2160_s12, %s2211_s6 }
 0x402   : > { %p1783_p13 = scmp.lt.u32.totalorder %s1781_s9, %s1777_s27  ;;  %p1785_p10 = scmp.lt.u32.totalorder %s1777_s27, %s2160_s12 }
 0x403   : > { %p1779_p0 = pnand %p1778_p9, %p2037_p5 }
 0x404   : > { %p1784_p6 = por %p1783_p13, %p1782_p8 }
 0x405   : > { %p1780_p11 = pneg %p1779_p0 }
 0x406   : > { %p1786_p3 = por %p1785_p10, %p1784_p6 }
 0x408   : > { %p1787_p7 = pnand %p1786_p3, %p1780_p11 }
 0x40a   : > { %1790 = shalt.err (!%p1787_p7)
}
 0x40b   : > { %s1846_s16 = smov 128   ;;  %s1847_s17 = smov 8  }
 0x40c   : > { %1582 = dma.vmem_to_hbm [thread:$0]  (%p2037_p5), %s2155_s10, 256, %s2160_s12, %s1051_s20, %s1846_s16, %s1846_s16, %s1847_s17  }
 0x40d PF: > { %s1079_s19 = sand.u32 1, %s1825_s21   ;;  %p2229_p12 = scmp.ne.s32.totalorder %s2216_s28, 0 }
 0x40e   : > { %p2230_p1 = scmp.ge.s32.totalorder %s1837_s24, 2  ;;  %s1080_s25 = scalar_lea.sflag [#allocation4], %s1079_s19 }
 0x410   : > { %p1599_p2 = pnand %p2230_p1, %p2229_p12 }
 0x412   : > { %1820 = dma.done.wait (!%p1599_p2), %s1080_s25, 256  }
 0x413   : > { %1822 = vsyncadd (!%p1599_p2), %s1080_s25, 4294967040  ;;  %p21_p4 = scmp.ge.s32.totalorder %s2023_s18, 4   ;;  %s2231_s21 = smov %s1829_s22 }
 0x414   : > { %s2232_s22 = smov %s1833_s23  ;;  %s2233_s23 = smov %s2033_s14 }
 0x415   : > { %s2234_s24 = smov %s2023_s18  ;;  %23 = sbr.rel (!%p21_p4) target bundleno = 7 (0x7), region = 102 }
 0x41c   :  { %1085 = vsyncpa [#allocation3], 1 }
 0x41d   :  { %1087 = vsyncpa [#allocation3 + $0x1], 1 }
 0x41e   :  { %1088 = vsyncpa [#allocation6], 1 }
 0x41f   :  { %1089 = vsyncpa [#allocation9], 1 }
 0x420   :  { %1090 = vsyncpa [#allocation4], 1 }
 0x421   :  { %1092 = vsyncpa [#allocation4 + $0x1], 1 }

</bundles_post_ra>
